<compile_context>
chip_gen: v5e
topology: v5e:2x2
jax: 0.10.0
libtpu: 0.0.40
codegen_flags: <defaults>
</compile_context>

<pallas_src>
import functools

import jax
import jax.numpy as jnp
from jax import lax
from jax.experimental import pallas as pl
from jax.experimental.pallas import tpu as pltpu


def _round_up(a: int, m: int) -> int:
    return ((a + m - 1) // m) * m


def _pad2d(x, rows: int, cols: int):
    b, d = x.shape
    if b == rows and d == cols:
        return x
    return jnp.pad(x, ((0, rows - b), (0, cols - d)))


def _alignment_loss_kernel(*refs, batch: int, dim: int, tile_rows: int,
                           rows_padded: bool, include_substance_loss: bool):
    """One batch tile: per-tile partial of
       mean_b(1 - cos(x_b, y_b)) [+ mean_{b,d}((x - m)^2)]  ->  out (1,1,1)."""
    if include_substance_loss:
        x_ref, y_ref, m_ref, out_ref = refs
    else:
        x_ref, y_ref, out_ref = refs
        m_ref = None

    x = x_ref[...].astype(jnp.float32)     # [TB, Dp] refined resume embeddings
    y = y_ref[...].astype(jnp.float32)     # [TB, Dp] job description embeddings
    tb, dp = x.shape
    n_chunks = dp // 128

    # Accumulate per-row partial products into 128-lane VPU accumulators across
    # D-chunks; one XLU lane-reduce per quantity at the end.
    dot_acc = jnp.zeros((tb, 128), jnp.float32)
    xx_acc = jnp.zeros((tb, 128), jnp.float32)
    yy_acc = jnp.zeros((tb, 128), jnp.float32)
    if include_substance_loss:
        m = m_ref[...].astype(jnp.float32)
        dd_acc = jnp.zeros((tb, 128), jnp.float32)
    for c in range(n_chunks):
        sl = slice(c * 128, (c + 1) * 128)
        xc = x[:, sl]
        yc = y[:, sl]
        dot_acc = dot_acc + xc * yc
        xx_acc = xx_acc + xc * xc
        yy_acc = yy_acc + yc * yc
        if include_substance_loss:
            dc = xc - m[:, sl]
            dd_acc = dd_acc + dc * dc

    dot = jnp.sum(dot_acc, axis=-1, keepdims=True)   # [TB, 1]
    nx2 = jnp.sum(xx_acc, axis=-1, keepdims=True)    # [TB, 1]
    ny2 = jnp.sum(yy_acc, axis=-1, keepdims=True)    # [TB, 1]

    # cos = dot / (max(|x|, eps) * max(|y|, eps)); rsqrt on eps^2-clamped squared
    # norms is mathematically identical and runs on the EUP.
    eps2 = jnp.float32(1e-16)
    cos = dot * lax.rsqrt(jnp.maximum(nx2, eps2)) * lax.rsqrt(jnp.maximum(ny2, eps2))
    one_minus = 1.0 - cos                            # [TB, 1]

    # Mask out zero-padded batch rows (only present when B % TB != 0).
    if rows_padded:
        row = (pl.program_id(0) * tile_rows
               + lax.broadcasted_iota(jnp.int32, (tile_rows, 1), 0))
        mask = (row < batch).astype(jnp.float32)     # [TB, 1]
    else:
        mask = None

    if mask is not None:
        one_minus = one_minus * mask
    # Partial of mean_b(1 - cos): divide by the ORIGINAL batch size.
    total = jnp.sum(one_minus, axis=0, keepdims=True) * jnp.float32(1.0 / batch)  # [1,1]

    if include_substance_loss:
        sq = jnp.sum(dd_acc, axis=-1, keepdims=True)  # [TB, 1] per-row sum of squares
        if mask is not None:
            sq = sq * mask
        # Partial of mean over ALL original elements (B * D, not padded sizes).
        total = total + (jnp.sum(sq, axis=0, keepdims=True)
                         * jnp.float32(1.0 / (batch * dim)))

    out_ref[0] = total


def alignment_loss_pallas(refined_embs, job_desc_embs, resume_mean=None,
                          include_substance_loss: bool = False,
                          vmem_limit_bytes: int = 32 * 1024 * 1024):
    """CosineEmbeddingLoss(target=+1, mean) [+ MSELoss(refined, resume_mean)]."""
    B, D = refined_embs.shape
    Dp = _round_up(D, 128)                     # lane-dense last dim
    n_inputs = 3 if include_substance_loss else 2

    # Size the batch tile so double-buffered input tiles use <= half the scoped
    # VMEM limit (safe for v7x's smaller VMEM; bigger tiles -> better pipelining).
    per_row_bytes = n_inputs * 2 * Dp * 4
    tb = max(8, min(1024, (vmem_limit_bytes // 2) // per_row_bytes))
    tb = max(8, (tb // 8) * 8)                 # sublane multiple
    tb = min(tb, _round_up(B, 8))
    Bp = _round_up(B, tb)
    grid_rows = Bp // tb

    x = _pad2d(refined_embs, Bp, Dp)
    y = _pad2d(job_desc_embs, Bp, Dp)
    inputs = [x, y]
    in_specs = [pl.BlockSpec((tb, Dp), lambda i: (i, 0)),
                pl.BlockSpec((tb, Dp), lambda i: (i, 0))]
    if include_substance_loss:
        if resume_mean is None:
            raise ValueError("resume_mean required when include_substance_loss=True")
        inputs.append(_pad2d(resume_mean, Bp, Dp))
        in_specs.append(pl.BlockSpec((tb, Dp), lambda i: (i, 0)))
    # NOTE: align-only path passes just 2 inputs -> no wasted resume_mean DMA.

    kernel = functools.partial(
        _alignment_loss_kernel,
        batch=B, dim=D, tile_rows=tb, rows_padded=(Bp != B),
        include_substance_loss=include_substance_loss)

    partials = pl.pallas_call(
        kernel,
        out_shape=jax.ShapeDtypeStruct((grid_rows, 1, 1), jnp.float32),
        grid=(grid_rows,),
        in_specs=in_specs,
        out_specs=pl.BlockSpec((1, 1, 1), lambda i: (i, 0, 0)),
        compiler_params=pltpu.CompilerParams(
            dimension_semantics=("parallel",),
            vmem_limit_bytes=vmem_limit_bytes),
    )(*inputs)
    # Tiny final reduction over per-tile partials (enables 2-TC sharding on v7x).
    return jnp.sum(partials)


# ---------------------------------------------------------------------------
# Deterministic stand-in for the external `transformer_model` (plain-JAX glue).
# TODO(synk): the real TransformerModel is an external module passed at call
# time; a deterministic entailment-weighted pooling + linear refiner stands in.
# ---------------------------------------------------------------------------
def toy_transformer(params, resume_embs, job_desc_embs, positions, entailment_scores):
    logits = entailment_scores + 0.01 * positions.astype(jnp.float32)   # [B, S]
    attn = jax.nn.softmax(logits, axis=-1)                              # [B, S]
    pooled = jnp.einsum('bs,bsd->bd', attn, resume_embs)                # [B, D]
    refined = jnp.tanh(pooled @ params['w'] + params['b'])              # [B, D]
    return refined


def _reference_loss(refined, job, resume_mean, include_substance_loss):
    dot = jnp.sum(refined * job, axis=-1)
    nx = jnp.sqrt(jnp.sum(refined * refined, axis=-1))
    ny = jnp.sqrt(jnp.sum(job * job, axis=-1))
    cos = dot / (jnp.maximum(nx, 1e-8) * jnp.maximum(ny, 1e-8))
    loss = jnp.mean(1.0 - cos)
    if include_substance_loss:
        loss = loss + jnp.mean((refined - resume_mean) ** 2)
    return loss


if __name__ == "__main__":
    key = jax.random.PRNGKey(0)
    B, S, D = 2, 8, 32
    k1, k2, k3, k4, k5, k6, k7 = jax.random.split(key, 7)

    resume_embs = jax.random.normal(k1, (B, S, D), dtype=jnp.float32)
    job_desc_embs = jax.random.normal(k2, (B, D), dtype=jnp.float32)
    positions = jnp.tile(jnp.arange(S, dtype=jnp.int32), (B, 1))
    entailment_scores = jax.random.uniform(k3, (B, S), dtype=jnp.float32)

    # Deterministic stand-in transformer parameters.
    w = jax.random.normal(k4, (D, D), dtype=jnp.float32) / jnp.sqrt(D)
    b = jnp.zeros((D,), dtype=jnp.float32)
    params = {"w": w, "b": b}

    refined = toy_transformer(params, resume_embs, job_desc_embs,
                              positions, entailment_scores)
    resume_mean = resume_embs.mean(axis=1)

    loss_align = alignment_loss_pallas(refined, job_desc_embs,
                                       include_substance_loss=False)
    loss_full = alignment_loss_pallas(refined, job_desc_embs, resume_mean,
                                      include_substance_loss=True)
    jax.block_until_ready((loss_align, loss_full))

    ref_align = _reference_loss(refined, job_desc_embs, resume_mean, False)
    ref_full = _reference_loss(refined, job_desc_embs, resume_mean, True)
    assert jnp.allclose(loss_align, ref_align, atol=1e-5), (loss_align, ref_align)
    assert jnp.allclose(loss_full, ref_full, atol=1e-5), (loss_full, ref_full)

    # Second sanity check: exercises D-chunking (D>128) and batch-row masking.
    B2, D2 = 20, 256
    r2 = jax.random.normal(k5, (B2, D2), dtype=jnp.float32)
    j2 = jax.random.normal(k6, (B2, D2), dtype=jnp.float32)
    m2 = jax.random.normal(k7, (B2, D2), dtype=jnp.float32)
    l2a = alignment_loss_pallas(r2, j2, include_substance_loss=False)
    l2f = alignment_loss_pallas(r2, j2, m2, include_substance_loss=True)
    jax.block_until_ready((l2a, l2f))
    assert jnp.allclose(l2a, _reference_loss(r2, j2, m2, False), atol=1e-4, rtol=1e-4)
    assert jnp.allclose(l2f, _reference_loss(r2, j2, m2, True), atol=1e-4, rtol=1e-4)

    print("KERNEL_OK")
</pallas_src>

<mosaic_0001>
module attributes {stable_mosaic.version = 11 : i64} {
  func.func @_alignment_loss_kernel(%arg0: i32, %arg1: memref<8x128xf32, #tpu.memory_space<vmem>>, %arg2: memref<8x128xf32, #tpu.memory_space<vmem>>, %arg3: memref<1x1x1xf32, #tpu.memory_space<vmem>>) attributes {dimension_semantics = [#tpu.dimension_semantics<parallel>], iteration_bounds = array<i64: 1>, scalar_prefetch = 0 : i64, scratch_operands = 0 : i64, tpu.core_type = #tpu.core_type<tc>, window_params = [{transform_indices = @transform_0, window_bounds = array<i64: 8, 128>}, {transform_indices = @transform_1, window_bounds = array<i64: 8, 128>}, {transform_indices = @transform_2, window_bounds = array<i64: 1, 1, 1>}]} {
    %c0 = arith.constant 0 : index
    %c0_0 = arith.constant 0 : index
    %0 = vector.load %arg1[%c0, %c0_0] : memref<8x128xf32, #tpu.memory_space<vmem>>, vector<8x128xf32>
    %c0_1 = arith.constant 0 : index
    %c0_2 = arith.constant 0 : index
    %1 = vector.load %arg2[%c0_1, %c0_2] : memref<8x128xf32, #tpu.memory_space<vmem>>, vector<8x128xf32>
    %cst = arith.constant 0.000000e+00 : f32
    %2 = vector.broadcast %cst : f32 to vector<8x128xf32>
    %cst_3 = arith.constant 0.000000e+00 : f32
    %3 = vector.broadcast %cst_3 : f32 to vector<8x128xf32>
    %cst_4 = arith.constant 0.000000e+00 : f32
    %4 = vector.broadcast %cst_4 : f32 to vector<8x128xf32>
    %5 = arith.mulf %0, %1 : vector<8x128xf32>
    %6 = arith.addf %2, %5 : vector<8x128xf32>
    %7 = arith.mulf %0, %0 : vector<8x128xf32>
    %8 = arith.addf %3, %7 : vector<8x128xf32>
    %9 = arith.mulf %1, %1 : vector<8x128xf32>
    %10 = arith.addf %4, %9 : vector<8x128xf32>
    %cst_5 = arith.constant dense<0.000000e+00> : vector<8xf32>
    %11 = vector.multi_reduction <add>, %6, %cst_5 [1] : vector<8x128xf32> to vector<8xf32>
    %12 = vector.shape_cast %11 : vector<8xf32> to vector<8x1xf32>
    %cst_6 = arith.constant dense<0.000000e+00> : vector<8xf32>
    %13 = vector.multi_reduction <add>, %8, %cst_6 [1] : vector<8x128xf32> to vector<8xf32>
    %14 = vector.shape_cast %13 : vector<8xf32> to vector<8x1xf32>
    %cst_7 = arith.constant dense<0.000000e+00> : vector<8xf32>
    %15 = vector.multi_reduction <add>, %10, %cst_7 [1] : vector<8x128xf32> to vector<8xf32>
    %16 = vector.shape_cast %15 : vector<8xf32> to vector<8x1xf32>
    %cst_8 = arith.constant 1.000000e-16 : f32
    %17 = vector.broadcast %cst_8 : f32 to vector<8x1xf32>
    %18 = arith.maximumf %14, %17 : vector<8x1xf32>
    %19 = math.rsqrt %18 : vector<8x1xf32>
    %20 = arith.mulf %12, %19 : vector<8x1xf32>
    %cst_9 = arith.constant 1.000000e-16 : f32
    %21 = vector.broadcast %cst_9 : f32 to vector<8x1xf32>
    %22 = arith.maximumf %16, %21 : vector<8x1xf32>
    %23 = math.rsqrt %22 : vector<8x1xf32>
    %24 = arith.mulf %20, %23 : vector<8x1xf32>
    %cst_10 = arith.constant 1.000000e+00 : f32
    %25 = vector.broadcast %cst_10 : f32 to vector<8x1xf32>
    %26 = arith.subf %25, %24 : vector<8x1xf32>
    %c8_i32 = arith.constant 8 : i32
    %27 = arith.muli %arg0, %c8_i32 : i32
    %28 = tpu.iota {dimensions = array<i32: 0>} : vector<8x1xi32>
    %29 = vector.broadcast %27 : i32 to vector<8x1xi32>
    %30 = arith.addi %29, %28 : vector<8x1xi32>
    %c2_i32 = arith.constant 2 : i32
    %31 = vector.broadcast %c2_i32 : i32 to vector<8x1xi32>
    %32 = arith.cmpi slt, %30, %31 : vector<8x1xi32>
    %33 = arith.extui %32 : vector<8x1xi1> to vector<8x1xi32>
    %34 = arith.sitofp %33 : vector<8x1xi32> to vector<8x1xf32>
    %35 = arith.mulf %26, %34 : vector<8x1xf32>
    %cst_11 = arith.constant dense<0.000000e+00> : vector<1xf32>
    %36 = vector.multi_reduction <add>, %35, %cst_11 [0] : vector<8x1xf32> to vector<1xf32>
    %37 = vector.shape_cast %36 : vector<1xf32> to vector<1x1xf32>
    %cst_12 = arith.constant 5.000000e-01 : f32
    %38 = vector.broadcast %cst_12 : f32 to vector<1x1xf32>
    %39 = arith.mulf %37, %38 : vector<1x1xf32>
    %c0_13 = arith.constant 0 : index
    %c0_14 = arith.constant 0 : index
    %c0_15 = arith.constant 0 : index
    %40 = vector.load %arg3[%c0_13, %c0_14, %c0_15] : memref<1x1x1xf32, #tpu.memory_space<vmem>>, vector<1x1x1xf32>
    %41 = vector.shape_cast %40 : vector<1x1x1xf32> to vector<1x1xf32>
    %42 = vector.shape_cast %39 : vector<1x1xf32> to vector<1x1x1xf32>
    tpu.vector_store %arg3[%c0_13, %c0_14, %c0_15], %42 {strides = array<i32>} : memref<1x1x1xf32, #tpu.memory_space<vmem>>, vector<1x1x1xf32>,
    return
  }
  func.func @transform_0(%arg0: i32) -> (i32, i32) {
    %c0_i32 = arith.constant 0 : i32
    %c0_i32_0 = arith.constant 0 : i32
    return %arg0, %c0_i32 : i32, i32
  }
  func.func @transform_1(%arg0: i32) -> (i32, i32) {
    %c0_i32 = arith.constant 0 : i32
    %c0_i32_0 = arith.constant 0 : i32
    return %arg0, %c0_i32 : i32, i32
  }
  func.func @transform_2(%arg0: i32) -> (i32, i32, i32) {
    %c0_i32 = arith.constant 0 : i32
    %c0_i32_0 = arith.constant 0 : i32
    %c0_i32_1 = arith.constant 0 : i32
    return %arg0, %c0_i32, %c0_i32_0 : i32, i32, i32
  }
}

</mosaic_0001>

<bundles_post_ra>
// kernel: tpu_custom_call.1
= control target key start
LH: loop header
LB: loop body
LE: loop exit
PB: predicated region body
PF: predicated region fallthrough
CT: control target
= control target key end

     0   :  { %7 = vsyncpa [#allocation3], 0  ;;  %s230_s0 = inlined_call_operand.hbm [shape: f32[8,128], index: 0, kind: input, shape index: {}]   ;;  %s231_s1 = inlined_call_operand.hbm [shape: f32[8,128], index: 1, kind: input, shape index: {}]   ;;  %s232_s2 = inlined_call_operand.hbm [shape: f32[1,1,1], index: 2, kind: output, shape index: {}]  }
   0x1   :  { %8 = vsyncpa [#allocation6], 0 }
   0x2   :  { %9 = vsyncpa [#allocation4], 0  ;;  %s15_s11 = sshll.u32 %s230_s0, 4  ;;  %s202_s12 = smov [#allocation2]   ;;  %s16_s11 = int_to_ptr.hbm [resolvable:$true] %s15_s11 }
   0x3   :  { %s17_s13 = sshll.u32 %s202_s12, 4  ;;  %s26_s16 = sshll.u32 %s231_s1, 4  ;;  %s18_s13 = int_to_ptr.vmem [resolvable:$true] %s17_s13  ;;  %s27_s16 = int_to_ptr.hbm [resolvable:$true] %s26_s16 }
   0x4   :  { %20 = dma.hbm_to_vmem [thread:$0]  %s16_s11, 128, %s18_s13, [#allocation3]  }
   0x5   :  { %s203_s17 = smov [#allocation5]  }
   0x6   :  { %s28_s18 = sshll.u32 %s203_s17, 4  ;;  %s29_s18 = int_to_ptr.vmem [resolvable:$true] %s28_s18 }
   0x7   :  { %31 = dma.hbm_to_vmem [thread:$0]  %s27_s16, 128, %s29_s18, [#allocation6]  }
   0x8   :  { %196 = dma.done.wait [#allocation3], 128  }
   0x9   :  { %197 = vsyncadd [#allocation3], 4294967168 }
   0xa   :  { %198 = dma.done.wait [#allocation6], 128  }
   0xb   :  { %199 = vsyncadd [#allocation6], 4294967168  ;;  %v40_v0 = vld [vmem:[#allocation2] sm:$0xff]  ;;  %v41_v1 = vld [vmem:[#allocation5] sm:$0xff]  ;;  %v80_v16 = vlaneseq  ;;  %v204_v28 = vmov 0.0   ;;  %s205_s0 = smov [#allocation7]  }
   0xc   :  { %v44_v2 = vmul.f32 %v40_v0, %v40_v0  ;;  %v42_v3 = vmul.f32 %v41_v1, %v40_v0  ;;  %v46_v4 = vmul.f32 %v41_v1, %v41_v1  ;;  %s102_s1 = sshll.u32 %s205_s0, 4  ;;  %s104_s21 = sshll.u32 %s232_s2, 4  ;;  %vm95_vm7 = vcmask 0   ;;  %s103_s1 = int_to_ptr.vmem [resolvable:$true] %s102_s1  ;;  %s105_s21 = int_to_ptr.hbm [resolvable:$true] %s104_s21 }
   0xd   :  { %v81_v20 = vshrl.u32 %v80_v16, 7 }
   0xe   :  { %50 = vadd.xlane.f32.xlu0 %v44_v2  ;;  %48 = vadd.xlane.f32.xlu1 %v42_v3 }
   0xf   :  { %vm84_vm6 = vcmp.lt.s32.totalorder %v81_v20, 2 }
  0x10   :  { %v115_v29 = vsel %vm84_vm6, 1.0, %v204_v28 }
  0x16   :  { %52 = vadd.xlane.f32.xlu0 %v46_v4 }
  0x81   :  { %v51_v5 = vpop.xlane.xlu0 %50  ;;  %v49_v23 = vpop.xlane.xlu1 %48 }
  0x82   :  { %v54_v6 = vmax.f32 %v51_v5, 1e-16 }
  0x84   :  { %120 = vrsqrt.f32 %v54_v6  ;;  %vm61_vm1 = vweird.f32 %v54_v6 }
  0x89   :  { %v53_v7 = vpop.xlane.xlu0 %52 }
  0x8a   :  { %v121_v8 = vpop.eup %120  ;;  %v66_v9 = vmax.f32 %v53_v7, 1e-16 }
  0x8b   :  { %v56_v10 = vmul.f32 %v121_v8, %v54_v6  ;;  %vm62_vm0 = vweird.f32 %v121_v8 }
  0x8c   :  { %122 = vrsqrt.f32 %v66_v9  ;;  %vm63_vm2 = vmor %vm61_vm1, %vm62_vm0  ;;  %vm73_vm4 = vweird.f32 %v66_v9 }
  0x8d   :  { %v57_v11 = vmul.f32 %v121_v8, %v56_v10 }
  0x8f   :  { %v58_v12 = vmul.f32 0.5, %v57_v11 }
  0x91   :  { %v59_v13 = vsub.f32 1.5, %v58_v12 }
  0x92   :  { %v123_v14 = vpop.eup %122 }
  0x93   :  { %v68_v15 = vmul.f32 %v123_v14, %v66_v9  ;;  %v60_v18 = vmul.f32 %v121_v8, %v59_v13  ;;  %vm74_vm3 = vweird.f32 %v123_v14 }
  0x94   :  { %vm75_vm5 = vmor %vm73_vm4, %vm74_vm3 }
  0x95   :  { %v69_v17 = vmul.f32 %v123_v14, %v68_v15  ;;  %v64_v22 = vsel %vm63_vm2, %v121_v8, %v60_v18 }
  0x96   :  { %v65_v25 = vmul.f32 %v64_v22, %v49_v23 }
  0x97   :  { %v70_v19 = vmul.f32 0.5, %v69_v17 }
  0x99   :  { %v71_v21 = vsub.f32 1.5, %v70_v19 }
  0x9b   :  { %v72_v24 = vmul.f32 %v123_v14, %v71_v21 }
  0x9d   :  { %v76_v26 = vsel %vm75_vm5, %v123_v14, %v72_v24 }
  0x9e   :  { %v77_v27 = vmul.f32 %v76_v26, %v65_v25 }
  0xa0   :  { %v78_v30 = vsub.f32 1.0, %v77_v27 }
  0xa2   :  { %v87_v31 = vmul.f32 %v115_v29, %v78_v30 }
  0xa4   :  { %v88_v32 = vrot.slane %v87_v31, 4 }
  0xa6   :  { %v89_v33 = vadd.f32 %v88_v32, %v87_v31 }
  0xa8   :  { %v90_v34 = vrot.slane %v89_v33, 2 }
  0xaa   :  { %v91_v35 = vadd.f32 %v90_v34, %v89_v33 }
  0xac   :  { %v92_v36 = vrot.slane %v91_v35, 1 }
  0xae   :  { %v93_v37 = vadd.f32 %v92_v36, %v91_v35 }
  0xb0   :  { %v94_v38 = vmul.f32 0.5, %v93_v37 }
  0xb2   :  { %96 = vst.msk [vmem:[#allocation7] sm:$0x1] %vm95_vm7, %v94_v38 }
  0xb3   :  { %107 = dma.vmem_to_hbm [thread:$0]  %s103_s1, 16, %s105_s21, [#allocation4]  }
  0xb4   :  { %200 = dma.done.wait [#allocation4], 16  }
  0xb5   :  { %201 = vsyncadd [#allocation4], 4294967280 }
  0xb6   :  { %112 = vsyncpa [#allocation3], 1 }
  0xb7   :  { %113 = vsyncpa [#allocation6], 1 }
  0xb8   :  { %114 = vsyncpa [#allocation4], 1 }

</bundles_post_ra>
